<compile_context>
chip_gen: v5e
topology: v5e:2x2
jax: 0.10.0
libtpu: 0.0.40
codegen_flags: <defaults>
</compile_context>

<pallas_src>
import jax
import jax.numpy as jnp
from jax.experimental import pallas as pl
from jax.experimental.pallas import tpu as pltpu


def _make_kernel(n_feat, loop_ops, b_in_row, b_out_row, has_lin, mxu_dtype, act_fn):
    K = n_feat + 2  # prepped-input width: [features | r | 1/r]

    def kernel(*refs):
        it = iter(refs)
        f_ref, x1_ref, x2_ref = next(it), next(it), next(it)
        wprep_ref = next(it)                        # (n_blk*K, H)      f32, resident
        wlin_ref = next(it) if has_lin else None    # (n_lin, H, H)     mxu_dtype, resident
        wout_ref = next(it)                         # (H, O)            mxu_dtype, resident
        vec_ref = next(it)                          # (n_vec, max(H,O)) f32, resident
        out_ref = next(it)                          # (TB, O)

        H = wout_ref.shape[0]
        O = wout_ref.shape[1]

        feats = f_ref[...].astype(jnp.float32)                        # (TB, F)
        dr = x1_ref[...].astype(jnp.float32) - x2_ref[...].astype(jnp.float32)
        ss = jnp.sum(dr * dr, axis=1, keepdims=True)                  # (TB, 1)
        r = jnp.sqrt(ss)
        rinv = jax.lax.rsqrt(ss)        # EUP rsqrt: no VALU divide, equals 1/r for r>0

        def vrow(row, ncols=H):
            # One packed (1, ncols) vector; broadcasts over the batch tile.
            return vec_ref[row:row + 1, :ncols]

        def prepped_linear(blk, bias_row):
            # [feats | r | 1/r] @ W + b with tiny K: VPU broadcast-FMAs, not the MXU
            # (a K<=6 contraction through the systolic array is almost pure fill/drain).
            base = blk * K
            z = (vrow(bias_row)
                 + r * wprep_ref[base + n_feat:base + n_feat + 1, :]
                 + rinv * wprep_ref[base + n_feat + 1:base + n_feat + 2, :])
            for k in range(n_feat):
                z = z + feats[:, k:k + 1] * wprep_ref[base + k:base + k + 1, :]
            return z

        xt = prepped_linear(0, b_in_row)            # input_connection(x)

        x = None
        for op in loop_ops:
            if op[0] == "lin_in":                   # net[0]: Linear(in_dim+2, H)
                z = prepped_linear(op[1], op[2])
            elif op[0] == "lin":                    # Linear(H, H): bf16 MXU, f32 accum
                z = jnp.dot(x.astype(mxu_dtype), wlin_ref[op[1]],
                            preferred_element_type=jnp.float32) + vrow(op[2])
            else:                                   # eval-mode BatchNorm1d -> affine
                z = x * vrow(op[1]) + vrow(op[2])
            x = act_fn(z + xt)
            # dropout(p=0.3): identity in eval mode

        out = jnp.dot(x.astype(mxu_dtype), wout_ref[...],
                      preferred_element_type=jnp.float32) + vrow(b_out_row, O)
        # O=2 -> masked store, but the output volume is tiny; a lane-dense transposed
        # layout would need an in-kernel relayout that costs more than it saves here.
        out_ref[...] = out.astype(out_ref.dtype)

    return kernel


def _round_up(x, m):
    return ((x + m - 1) // m) * m


def nn_skip_shared_pallas(features, x1, x2, params, *, tile_b=None,
                          mxu_dtype=jnp.bfloat16):
    B, F = features.shape
    C = x1.shape[1]
    H = params["W_in"].shape[1]
    O = params["W_out"].shape[1]

    # --- batch tiling: large tiles amortize the ~0.35us per-grid-step overhead.
    # Capped at 128 (256 also fine) so live (tile_b, H) activations stay inside the
    # vreg budget; VMEM footprint is tiny on all of v5e/v6e/v7x.  Tail rows are
    # zero-padded and sliced off afterwards (pl.cdiv grid, no dropped rows).
    if tile_b is None:
        tile_b = min(128, _round_up(B, 8))
    tile_b = max(8, _round_up(tile_b, 8))
    grid_n = pl.cdiv(B, tile_b)
    B_pad = grid_n * tile_b
    if B_pad != B:
        features = jnp.pad(features, ((0, B_pad - B), (0, 0)))
        x1 = jnp.pad(x1, ((0, B_pad - B), (0, 0)))
        x2 = jnp.pad(x2, ((0, B_pad - B), (0, 0)))

    # --- pack parameters into a handful of dense, grid-resident refs --------------
    Hmax = max(H, O)
    vec_rows = []

    def add_vec(v):
        row = jnp.zeros((Hmax,), jnp.float32).at[:v.shape[0]].set(v.astype(jnp.float32))
        vec_rows.append(row)
        return len(vec_rows) - 1

    b_in_row = add_vec(params["b_in"])
    wprep_blocks = [params["W_in"].astype(jnp.float32)]    # block 0 = input_connection
    wlin_blocks = []
    loop_ops = []
    for kind, lp in zip(params["layer_kinds"], params["loop_params"]):
        if kind == "lin_in":
            blk = len(wprep_blocks)
            wprep_blocks.append(lp["W"].astype(jnp.float32))
            loop_ops.append(("lin_in", blk, add_vec(lp["b"])))
        elif kind == "lin":
            idx = len(wlin_blocks)
            wlin_blocks.append(lp["W"].astype(mxu_dtype))
            loop_ops.append(("lin", idx, add_vec(lp["b"])))
        else:  # bn (eval-mode affine)
            loop_ops.append(("bn", add_vec(lp["scale"]), add_vec(lp["shift"])))
    b_out_row = add_vec(params["b_out"])

    wprep = jnp.concatenate(wprep_blocks, axis=0)          # (n_blk*(F+2), H) f32
    wout = params["W_out"].astype(mxu_dtype)               # (H, O)
    vecs = jnp.stack(vec_rows, axis=0)                     # (n_vec, Hmax) f32
    has_lin = bool(wlin_blocks)

    def batch_spec(ncols):
        return pl.BlockSpec((tile_b, ncols), lambda i: (i, 0))

    def resident_spec(a):
        # Constant index_map -> fetched once, stays resident in VMEM across the grid.
        return pl.BlockSpec(a.shape, lambda i, _n=a.ndim: (0,) * _n)

    arrays = [features, x1, x2, wprep]
    in_specs = [batch_spec(F), batch_spec(C), batch_spec(C), resident_spec(wprep)]
    if has_lin:
        wlin = jnp.stack(wlin_blocks, axis=0)              # (n_lin, H, H)
        arrays.append(wlin)
        in_specs.append(resident_spec(wlin))
    arrays += [wout, vecs]
    in_specs += [resident_spec(wout), resident_spec(vecs)]

    kernel = _make_kernel(F, tuple(loop_ops), b_in_row, b_out_row, has_lin,
                          mxu_dtype, jax.nn.relu)

    out = pl.pallas_call(
        kernel,
        out_shape=jax.ShapeDtypeStruct((B_pad, O), jnp.float32),
        grid=(grid_n,),
        in_specs=in_specs,
        out_specs=pl.BlockSpec((tile_b, O), lambda i: (i, 0)),
        compiler_params=pltpu.CompilerParams(dimension_semantics=("parallel",)),
    )(*arrays)
    return out[:B] if B_pad != B else out


def nn_skip_shared_reference(features, x1, x2, params, *, mxu_dtype=jnp.float32):
    """Pure-JAX reference.  mxu_dtype=bf16 mirrors the kernel's MXU operand dtype on
    the H-wide matmuls; the prepped-input linears stay true-f32 like the kernel."""
    hp = jax.lax.Precision.HIGHEST
    dr = x1 - x2
    r = jnp.sqrt(jnp.sum(dr * dr, axis=1, keepdims=True))
    x = jnp.concatenate([features, r, 1.0 / r], axis=1)
    xt = jnp.dot(x, params["W_in"], precision=hp) + params["b_in"]
    for kind, lp in zip(params["layer_kinds"], params["loop_params"]):
        if kind == "lin_in":
            z = jnp.dot(x, lp["W"], precision=hp) + lp["b"]
        elif kind == "lin":
            z = jnp.dot(x.astype(mxu_dtype), lp["W"].astype(mxu_dtype),
                        preferred_element_type=jnp.float32, precision=hp) + lp["b"]
        else:
            z = x * lp["scale"] + lp["shift"]
        x = jax.nn.relu(z + xt)
    return jnp.dot(x.astype(mxu_dtype), params["W_out"].astype(mxu_dtype),
                   preferred_element_type=jnp.float32, precision=hp) + params["b_out"]


def init_params(key, in_dim, hidden_dim, out_dim, n_layers):
    """Deterministic init mirroring the module's __init__ (xavier weights, default
    bias / BatchNorm running stats)."""
    in_full = in_dim + 2
    eps = 1e-5

    def linear_init(k, fan_in, fan_out):
        kw, kb = jax.random.split(k)
        bound_w = (6.0 / (fan_in + fan_out)) ** 0.5           # xavier_uniform_
        W = jax.random.uniform(kw, (fan_in, fan_out), jnp.float32, -bound_w, bound_w)
        bound_b = 1.0 / (fan_in ** 0.5)                        # torch default bias init
        b = jax.random.uniform(kb, (fan_out,), jnp.float32, -bound_b, bound_b)
        return W, b

    # _get_net() structure with batch_norm=True
    net_struct = [("linear", in_full, hidden_dim)]
    for _ in range(n_layers - 1):
        net_struct.append(("linear", hidden_dim, hidden_dim))
        net_struct.append(("bn", hidden_dim))
    net_struct.append(("linear", hidden_dim, out_dim))

    keys = jax.random.split(key, len(net_struct) + 1)
    net_params = []
    for k, entry in zip(keys[:-1], net_struct):
        if entry[0] == "linear":
            W, b = linear_init(k, entry[1], entry[2])
            net_params.append({"W": W, "b": b})
        else:
            h = entry[1]
            # BatchNorm1d defaults: weight=1, bias=0, running_mean=0, running_var=1
            scale = jnp.ones((h,), jnp.float32) / jnp.sqrt(1.0 + eps)
            shift = jnp.zeros((h,), jnp.float32)
            net_params.append({"scale": scale, "shift": shift})

    W_in, b_in = linear_init(keys[-1], in_full, hidden_dim)    # input_connection

    # forward uses net[0 .. n_layers-1] and net[-1]
    layer_kinds, loop_params = [], []
    for i in range(n_layers):
        kind, *_ = net_struct[i]
        if kind == "linear":
            layer_kinds.append("lin_in" if i == 0 else "lin")
        else:
            layer_kinds.append("bn")
        loop_params.append(net_params[i])

    return {
        "W_in": W_in, "b_in": b_in,
        "layer_kinds": layer_kinds, "loop_params": loop_params,
        "W_out": net_params[-1]["W"], "b_out": net_params[-1]["b"],
    }


if __name__ == "__main__":
    in_dim, hidden_dim, out_dim, n_layers = 4, 32, 2, 3
    coord_dim = 3

    key = jax.random.PRNGKey(0)
    kp, kdata = jax.random.split(key)
    params = init_params(kp, in_dim, hidden_dim, out_dim, n_layers)

    for B in (16, 300):   # 300 exercises the batch-tail padding path (300 % 128 != 0)
        kdata, kf, k1, k2 = jax.random.split(kdata, 4)
        features = jax.random.normal(kf, (B, in_dim), jnp.float32)
        x1 = jax.random.normal(k1, (B, coord_dim), jnp.float32)
        x2 = jax.random.normal(k2, (B, coord_dim), jnp.float32)

        out = jax.block_until_ready(nn_skip_shared_pallas(features, x1, x2, params))
        assert out.shape == (B, out_dim)

        # tight check vs a reference with matching (bf16-operand) matmul numerics
        ref_m = jax.block_until_ready(
            nn_skip_shared_reference(features, x1, x2, params, mxu_dtype=jnp.bfloat16))
        assert jnp.allclose(out, ref_m, rtol=5e-3, atol=5e-3), (
            f"B={B} matched-ref max abs err {float(jnp.max(jnp.abs(out - ref_m)))}")

        # sanity check vs the full-f32 (PyTorch-equivalent) reference
        ref_f = jax.block_until_ready(
            nn_skip_shared_reference(features, x1, x2, params, mxu_dtype=jnp.float32))
        assert jnp.allclose(out, ref_f, rtol=5e-2, atol=5e-2), (
            f"B={B} f32-ref max abs err {float(jnp.max(jnp.abs(out - ref_f)))}")

    print("KERNEL_OK")
</pallas_src>

<mosaic_0001>
module attributes {stable_mosaic.version = 11 : i64} {
  func.func @kernel(%arg0: i32, %arg1: memref<16x4xf32, #tpu.memory_space<vmem>>, %arg2: memref<16x3xf32, #tpu.memory_space<vmem>>, %arg3: memref<16x3xf32, #tpu.memory_space<vmem>>, %arg4: memref<12x32xf32, #tpu.memory_space<vmem>>, %arg5: memref<1x32x32xbf16, #tpu.memory_space<vmem>>, %arg6: memref<32x2xbf16, #tpu.memory_space<vmem>>, %arg7: memref<6x32xf32, #tpu.memory_space<vmem>>, %arg8: memref<16x2xf32, #tpu.memory_space<vmem>>) attributes {dimension_semantics = [#tpu.dimension_semantics<parallel>], iteration_bounds = array<i64: 1>, scalar_prefetch = 0 : i64, scratch_operands = 0 : i64, tpu.core_type = #tpu.core_type<tc>, window_params = [{transform_indices = @transform_0, window_bounds = array<i64: 16, 4>}, {transform_indices = @transform_1, window_bounds = array<i64: 16, 3>}, {transform_indices = @transform_2, window_bounds = array<i64: 16, 3>}, {pipeline_mode = #tpu.pipeline_mode<synchronous>, transform_indices = @transform_3, window_bounds = array<i64: 12, 32>}, {pipeline_mode = #tpu.pipeline_mode<synchronous>, transform_indices = @transform_4, window_bounds = array<i64: 1, 32, 32>}, {pipeline_mode = #tpu.pipeline_mode<synchronous>, transform_indices = @transform_5, window_bounds = array<i64: 32, 2>}, {pipeline_mode = #tpu.pipeline_mode<synchronous>, transform_indices = @transform_6, window_bounds = array<i64: 6, 32>}, {transform_indices = @transform_7, window_bounds = array<i64: 16, 2>}]} {
    %c0 = arith.constant 0 : index
    %c0_0 = arith.constant 0 : index
    %0 = vector.load %arg1[%c0, %c0_0] : memref<16x4xf32, #tpu.memory_space<vmem>>, vector<16x4xf32>
    %c0_1 = arith.constant 0 : index
    %c0_2 = arith.constant 0 : index
    %1 = vector.load %arg2[%c0_1, %c0_2] : memref<16x3xf32, #tpu.memory_space<vmem>>, vector<16x3xf32>
    %c0_3 = arith.constant 0 : index
    %c0_4 = arith.constant 0 : index
    %2 = vector.load %arg3[%c0_3, %c0_4] : memref<16x3xf32, #tpu.memory_space<vmem>>, vector<16x3xf32>
    %3 = arith.subf %1, %2 : vector<16x3xf32>
    %4 = arith.mulf %3, %3 : vector<16x3xf32>
    %cst = arith.constant dense<0.000000e+00> : vector<16xf32>
    %5 = vector.multi_reduction <add>, %4, %cst [1] : vector<16x3xf32> to vector<16xf32>
    %6 = vector.shape_cast %5 : vector<16xf32> to vector<16x1xf32>
    %7 = math.sqrt %6 : vector<16x1xf32>
    %8 = math.rsqrt %6 : vector<16x1xf32>
    %c0_5 = arith.constant 0 : index
    %c0_6 = arith.constant 0 : index
    %9 = vector.load %arg7[%c0_5, %c0_6] : memref<6x32xf32, #tpu.memory_space<vmem>>, vector<1x32xf32>
    %c4 = arith.constant 4 : index
    %c0_7 = arith.constant 0 : index
    %10 = vector.load %arg4[%c4, %c0_7] : memref<12x32xf32, #tpu.memory_space<vmem>>, vector<1x32xf32>
    %11 = vector.broadcast %7 : vector<16x1xf32> to vector<16x32xf32>
    %12 = vector.broadcast %10 : vector<1x32xf32> to vector<16x32xf32>
    %13 = arith.mulf %11, %12 : vector<16x32xf32>
    %14 = vector.broadcast %9 : vector<1x32xf32> to vector<16x32xf32>
    %15 = arith.addf %14, %13 : vector<16x32xf32>
    %c5 = arith.constant 5 : index
    %c0_8 = arith.constant 0 : index
    %16 = vector.load %arg4[%c5, %c0_8] : memref<12x32xf32, #tpu.memory_space<vmem>>, vector<1x32xf32>
    %17 = vector.broadcast %8 : vector<16x1xf32> to vector<16x32xf32>
    %18 = vector.broadcast %16 : vector<1x32xf32> to vector<16x32xf32>
    %19 = arith.mulf %17, %18 : vector<16x32xf32>
    %20 = arith.addf %15, %19 : vector<16x32xf32>
    %21 = vector.extract_strided_slice %0 {offsets = [0, 0], sizes = [16, 1], strides = [1, 1]} : vector<16x4xf32> to vector<16x1xf32>
    %c0_9 = arith.constant 0 : index
    %c0_10 = arith.constant 0 : index
    %22 = vector.load %arg4[%c0_9, %c0_10] : memref<12x32xf32, #tpu.memory_space<vmem>>, vector<1x32xf32>
    %23 = vector.broadcast %21 : vector<16x1xf32> to vector<16x32xf32>
    %24 = vector.broadcast %22 : vector<1x32xf32> to vector<16x32xf32>
    %25 = arith.mulf %23, %24 : vector<16x32xf32>
    %26 = arith.addf %20, %25 : vector<16x32xf32>
    %27 = vector.extract_strided_slice %0 {offsets = [0, 1], sizes = [16, 1], strides = [1, 1]} : vector<16x4xf32> to vector<16x1xf32>
    %c1 = arith.constant 1 : index
    %c0_11 = arith.constant 0 : index
    %28 = vector.load %arg4[%c1, %c0_11] : memref<12x32xf32, #tpu.memory_space<vmem>>, vector<1x32xf32>
    %29 = vector.broadcast %27 : vector<16x1xf32> to vector<16x32xf32>
    %30 = vector.broadcast %28 : vector<1x32xf32> to vector<16x32xf32>
    %31 = arith.mulf %29, %30 : vector<16x32xf32>
    %32 = arith.addf %26, %31 : vector<16x32xf32>
    %33 = vector.extract_strided_slice %0 {offsets = [0, 2], sizes = [16, 1], strides = [1, 1]} : vector<16x4xf32> to vector<16x1xf32>
    %c2 = arith.constant 2 : index
    %c0_12 = arith.constant 0 : index
    %34 = vector.load %arg4[%c2, %c0_12] : memref<12x32xf32, #tpu.memory_space<vmem>>, vector<1x32xf32>
    %35 = vector.broadcast %33 : vector<16x1xf32> to vector<16x32xf32>
    %36 = vector.broadcast %34 : vector<1x32xf32> to vector<16x32xf32>
    %37 = arith.mulf %35, %36 : vector<16x32xf32>
    %38 = arith.addf %32, %37 : vector<16x32xf32>
    %39 = vector.extract_strided_slice %0 {offsets = [0, 3], sizes = [16, 1], strides = [1, 1]} : vector<16x4xf32> to vector<16x1xf32>
    %c3 = arith.constant 3 : index
    %c0_13 = arith.constant 0 : index
    %40 = vector.load %arg4[%c3, %c0_13] : memref<12x32xf32, #tpu.memory_space<vmem>>, vector<1x32xf32>
    %41 = vector.broadcast %39 : vector<16x1xf32> to vector<16x32xf32>
    %42 = vector.broadcast %40 : vector<1x32xf32> to vector<16x32xf32>
    %43 = arith.mulf %41, %42 : vector<16x32xf32>
    %44 = arith.addf %38, %43 : vector<16x32xf32>
    %c1_14 = arith.constant 1 : index
    %c0_15 = arith.constant 0 : index
    %45 = vector.load %arg7[%c1_14, %c0_15] : memref<6x32xf32, #tpu.memory_space<vmem>>, vector<1x32xf32>
    %c10 = arith.constant 10 : index
    %c0_16 = arith.constant 0 : index
    %46 = vector.load %arg4[%c10, %c0_16] : memref<12x32xf32, #tpu.memory_space<vmem>>, vector<1x32xf32>
    %47 = vector.broadcast %7 : vector<16x1xf32> to vector<16x32xf32>
    %48 = vector.broadcast %46 : vector<1x32xf32> to vector<16x32xf32>
    %49 = arith.mulf %47, %48 : vector<16x32xf32>
    %50 = vector.broadcast %45 : vector<1x32xf32> to vector<16x32xf32>
    %51 = arith.addf %50, %49 : vector<16x32xf32>
    %c11 = arith.constant 11 : index
    %c0_17 = arith.constant 0 : index
    %52 = vector.load %arg4[%c11, %c0_17] : memref<12x32xf32, #tpu.memory_space<vmem>>, vector<1x32xf32>
    %53 = vector.broadcast %8 : vector<16x1xf32> to vector<16x32xf32>
    %54 = vector.broadcast %52 : vector<1x32xf32> to vector<16x32xf32>
    %55 = arith.mulf %53, %54 : vector<16x32xf32>
    %56 = arith.addf %51, %55 : vector<16x32xf32>
    %57 = vector.extract_strided_slice %0 {offsets = [0, 0], sizes = [16, 1], strides = [1, 1]} : vector<16x4xf32> to vector<16x1xf32>
    %c6 = arith.constant 6 : index
    %c0_18 = arith.constant 0 : index
    %58 = vector.load %arg4[%c6, %c0_18] : memref<12x32xf32, #tpu.memory_space<vmem>>, vector<1x32xf32>
    %59 = vector.broadcast %57 : vector<16x1xf32> to vector<16x32xf32>
    %60 = vector.broadcast %58 : vector<1x32xf32> to vector<16x32xf32>
    %61 = arith.mulf %59, %60 : vector<16x32xf32>
    %62 = arith.addf %56, %61 : vector<16x32xf32>
    %63 = vector.extract_strided_slice %0 {offsets = [0, 1], sizes = [16, 1], strides = [1, 1]} : vector<16x4xf32> to vector<16x1xf32>
    %c7 = arith.constant 7 : index
    %c0_19 = arith.constant 0 : index
    %64 = vector.load %arg4[%c7, %c0_19] : memref<12x32xf32, #tpu.memory_space<vmem>>, vector<1x32xf32>
    %65 = vector.broadcast %63 : vector<16x1xf32> to vector<16x32xf32>
    %66 = vector.broadcast %64 : vector<1x32xf32> to vector<16x32xf32>
    %67 = arith.mulf %65, %66 : vector<16x32xf32>
    %68 = arith.addf %62, %67 : vector<16x32xf32>
    %69 = vector.extract_strided_slice %0 {offsets = [0, 2], sizes = [16, 1], strides = [1, 1]} : vector<16x4xf32> to vector<16x1xf32>
    %c8 = arith.constant 8 : index
    %c0_20 = arith.constant 0 : index
    %70 = vector.load %arg4[%c8, %c0_20] : memref<12x32xf32, #tpu.memory_space<vmem>>, vector<1x32xf32>
    %71 = vector.broadcast %69 : vector<16x1xf32> to vector<16x32xf32>
    %72 = vector.broadcast %70 : vector<1x32xf32> to vector<16x32xf32>
    %73 = arith.mulf %71, %72 : vector<16x32xf32>
    %74 = arith.addf %68, %73 : vector<16x32xf32>
    %75 = vector.extract_strided_slice %0 {offsets = [0, 3], sizes = [16, 1], strides = [1, 1]} : vector<16x4xf32> to vector<16x1xf32>
    %c9 = arith.constant 9 : index
    %c0_21 = arith.constant 0 : index
    %76 = vector.load %arg4[%c9, %c0_21] : memref<12x32xf32, #tpu.memory_space<vmem>>, vector<1x32xf32>
    %77 = vector.broadcast %75 : vector<16x1xf32> to vector<16x32xf32>
    %78 = vector.broadcast %76 : vector<1x32xf32> to vector<16x32xf32>
    %79 = arith.mulf %77, %78 : vector<16x32xf32>
    %80 = arith.addf %74, %79 : vector<16x32xf32>
    %81 = arith.addf %80, %44 : vector<16x32xf32>
    %cst_22 = arith.constant 0.000000e+00 : f32
    %82 = vector.broadcast %cst_22 : f32 to vector<16x32xf32>
    %83 = arith.maximumf %81, %82 : vector<16x32xf32>
    %84 = arith.truncf %83 : vector<16x32xf32> to vector<16x32xbf16>
    %c0_23 = arith.constant 0 : index
    %c0_24 = arith.constant 0 : index
    %c0_25 = arith.constant 0 : index
    %85 = vector.load %arg5[%c0_23, %c0_24, %c0_25] : memref<1x32x32xbf16, #tpu.memory_space<vmem>>, vector<1x32x32xbf16>
    %86 = vector.shape_cast %85 : vector<1x32x32xbf16> to vector<32x32xbf16>
    %cst_26 = arith.constant dense<0.000000e+00> : vector<16x32xf32>
    %87 = tpu.matmul %84, %86, %cst_26 {dimension_numbers = #tpu.dot_dimension_numbers<[1], [0], [0], [1], [0, 0, 1, 1], [], []>} : vector<16x32xbf16>, vector<32x32xbf16>, vector<16x32xf32> -> vector<16x32xf32>
    %c2_27 = arith.constant 2 : index
    %c0_28 = arith.constant 0 : index
    %88 = vector.load %arg7[%c2_27, %c0_28] : memref<6x32xf32, #tpu.memory_space<vmem>>, vector<1x32xf32>
    %89 = vector.broadcast %88 : vector<1x32xf32> to vector<16x32xf32>
    %90 = arith.addf %87, %89 : vector<16x32xf32>
    %91 = arith.addf %90, %44 : vector<16x32xf32>
    %cst_29 = arith.constant 0.000000e+00 : f32
    %92 = vector.broadcast %cst_29 : f32 to vector<16x32xf32>
    %93 = arith.maximumf %91, %92 : vector<16x32xf32>
    %c3_30 = arith.constant 3 : index
    %c0_31 = arith.constant 0 : index
    %94 = vector.load %arg7[%c3_30, %c0_31] : memref<6x32xf32, #tpu.memory_space<vmem>>, vector<1x32xf32>
    %95 = vector.broadcast %94 : vector<1x32xf32> to vector<16x32xf32>
    %96 = arith.mulf %93, %95 : vector<16x32xf32>
    %c4_32 = arith.constant 4 : index
    %c0_33 = arith.constant 0 : index
    %97 = vector.load %arg7[%c4_32, %c0_33] : memref<6x32xf32, #tpu.memory_space<vmem>>, vector<1x32xf32>
    %98 = vector.broadcast %97 : vector<1x32xf32> to vector<16x32xf32>
    %99 = arith.addf %96, %98 : vector<16x32xf32>
    %100 = arith.addf %99, %44 : vector<16x32xf32>
    %cst_34 = arith.constant 0.000000e+00 : f32
    %101 = vector.broadcast %cst_34 : f32 to vector<16x32xf32>
    %102 = arith.maximumf %100, %101 : vector<16x32xf32>
    %103 = arith.truncf %102 : vector<16x32xf32> to vector<16x32xbf16>
    %c0_35 = arith.constant 0 : index
    %c0_36 = arith.constant 0 : index
    %104 = vector.load %arg6[%c0_35, %c0_36] : memref<32x2xbf16, #tpu.memory_space<vmem>>, vector<32x2xbf16>
    %cst_37 = arith.constant dense<0.000000e+00> : vector<16x2xf32>
    %105 = tpu.matmul %103, %104, %cst_37 {dimension_numbers = #tpu.dot_dimension_numbers<[1], [0], [0], [1], [0, 0, 1, 1], [], []>} : vector<16x32xbf16>, vector<32x2xbf16>, vector<16x2xf32> -> vector<16x2xf32>
    %c5_38 = arith.constant 5 : index
    %c0_39 = arith.constant 0 : index
    %106 = vector.load %arg7[%c5_38, %c0_39] : memref<6x32xf32, #tpu.memory_space<vmem>>, vector<1x2xf32>
    %107 = vector.broadcast %106 : vector<1x2xf32> to vector<16x2xf32>
    %108 = arith.addf %105, %107 : vector<16x2xf32>
    %c0_40 = arith.constant 0 : index
    %c0_41 = arith.constant 0 : index
    %109 = vector.load %arg8[%c0_40, %c0_41] : memref<16x2xf32, #tpu.memory_space<vmem>>, vector<16x2xf32>
    tpu.vector_store %arg8[%c0_40, %c0_41], %108 {strides = array<i32>} : memref<16x2xf32, #tpu.memory_space<vmem>>, vector<16x2xf32>,
    return
  }
  func.func @transform_0(%arg0: i32) -> (i32, i32) {
    %c0_i32 = arith.constant 0 : i32
    %c0_i32_0 = arith.constant 0 : i32
    return %arg0, %c0_i32 : i32, i32
  }
  func.func @transform_1(%arg0: i32) -> (i32, i32) {
    %c0_i32 = arith.constant 0 : i32
    %c0_i32_0 = arith.constant 0 : i32
    return %arg0, %c0_i32 : i32, i32
  }
  func.func @transform_2(%arg0: i32) -> (i32, i32) {
    %c0_i32 = arith.constant 0 : i32
    %c0_i32_0 = arith.constant 0 : i32
    return %arg0, %c0_i32 : i32, i32
  }
  func.func @transform_3(%arg0: i32) -> (i32, i32) {
    %c0_i32 = arith.constant 0 : i32
    %c0_i32_0 = arith.constant 0 : i32
    %c0_i32_1 = arith.constant 0 : i32
    return %c0_i32, %c0_i32_0 : i32, i32
  }
  func.func @transform_4(%arg0: i32) -> (i32, i32, i32) {
    %c0_i32 = arith.constant 0 : i32
    %c0_i32_0 = arith.constant 0 : i32
    %c0_i32_1 = arith.constant 0 : i32
    %c0_i32_2 = arith.constant 0 : i32
    return %c0_i32, %c0_i32_0, %c0_i32_1 : i32, i32, i32
  }
  func.func @transform_5(%arg0: i32) -> (i32, i32) {
    %c0_i32 = arith.constant 0 : i32
    %c0_i32_0 = arith.constant 0 : i32
    %c0_i32_1 = arith.constant 0 : i32
    return %c0_i32, %c0_i32_0 : i32, i32
  }
  func.func @transform_6(%arg0: i32) -> (i32, i32) {
    %c0_i32 = arith.constant 0 : i32
    %c0_i32_0 = arith.constant 0 : i32
    %c0_i32_1 = arith.constant 0 : i32
    return %c0_i32, %c0_i32_0 : i32, i32
  }
  func.func @transform_7(%arg0: i32) -> (i32, i32) {
    %c0_i32 = arith.constant 0 : i32
    %c0_i32_0 = arith.constant 0 : i32
    return %arg0, %c0_i32 : i32, i32
  }
}

</mosaic_0001>

<bundles_post_ra>
// kernel: tpu_custom_call.1
= control target key start
LH: loop header
LB: loop body
LE: loop exit
PB: predicated region body
PF: predicated region fallthrough
CT: control target
= control target key end

     0   :  { %v353_v2 = vmov 0   ;;  %v354_v4 = vmov 2   ;;  %vm37_vm0 = vcmask 23552   ;;  %v355_v10 = vmov 1   ;;  %s504_s1 = inlined_call_operand.vmem [shape: f32[16,3], index: 1, kind: input, shape index: {}]   ;;  %s505_s2 = inlined_call_operand.vmem [shape: f32[16,3], index: 2, kind: input, shape index: {}]   ;;  %s506_s0 = inlined_call_operand.vmem [shape: f32[16,4], index: 0, kind: input, shape index: {}]   ;;  %s507_s3 = inlined_call_operand.vmem [shape: f32[12,32], index: 3, kind: input, shape index: {}]   ;;  %s508_s6 = inlined_call_operand.vmem [shape: f32[6,32], index: 6, kind: input, shape index: {}]   ;;  %s509_s4 = inlined_call_operand.vmem [shape: bf16[1,32,32], index: 4, kind: input, shape index: {}]   ;;  %s510_s5 = inlined_call_operand.vmem [shape: bf16[32,2], index: 5, kind: input, shape index: {}]   ;;  %s511_s7 = inlined_call_operand.vmem [shape: f32[16,2], index: 7, kind: output, shape index: {}]  }
   0x1   :  { %v29_v0 = vld [vmem:[%s504_s1] sm:$0xff]  ;;  %324 = vset.pattern.permute.xlu1 %v353_v2  ;;  %326 = vset.pattern.permute.xlu0 %v354_v4  ;;  %v30_v6 = vld [vmem:[%s504_s1 + $0x8] sm:$0xff]  ;;  %v356_v15 = vmov 3   ;;  %vm221_vm11 = vcmask 261120   ;;  %vm291_vm12 = vcmask 15360  }
   0x2   :  { %v31_v1 = vld [vmem:[%s505_s2] sm:$0xff]  ;;  %v32_v7 = vld [vmem:[%s505_s2 + $0x8] sm:$0xff]  ;;  %325 = vset.pattern.permute.xlu2 %v355_v10 }
   0x3   :  { %v27_v3 = vld [vmem:[%s506_s0] sm:$0xff]  ;;  %v33_v5 = vsub.f32 %v29_v0, %v31_v1  ;;  %v34_v9 = vsub.f32 %v30_v6, %v32_v7  ;;  %v28_v12 = vld [vmem:[%s506_s0 + $0x8] sm:$0xff] }
   0x4   :  { %105 = vperm.xlu1 %324, %v27_v3   ;;  %120 = vperm.xlu2 %325, %v27_v3   ;;  %v317_v23 = vld [vmem:[%s509_s4 + $0x8] sm:$0xff]  ;;  %v316_v26 = vld [vmem:[%s509_s4] sm:$0xff] }
   0x5   :  { %v35_v8 = vmul.f32 %v33_v5, %v33_v5  ;;  %v36_v13 = vmul.f32 %v34_v9, %v34_v9  ;;  %231 = vmatpush.bf16.msra.mxu0 %v317_v23  ;;  %v331_v32 = vld [vmem:[%s507_s3 + $0x4] ss:$0 sm:$0xff]  ;;  %v335_v33 = vld [vmem:[%s507_s3 + $0xa] ss:$0 sm:$0xff]  ;;  %v333_v36 = vld [vmem:[%s507_s3 + $0x5] ss:$0 sm:$0xff] }
   0x6   :  { %v337_v37 = vld [vmem:[%s507_s3 + $0xb] ss:$0 sm:$0xff]  ;;  %v332_v40 = vld [vmem:[%s508_s6] ss:$0 sm:$0xff]  ;;  %v336_v41 = vld [vmem:[%s508_s6 + $0x1] ss:$0 sm:$0xff] }
   0x7   :  { %v38_v11 = vsel %vm37_vm0, %v35_v8, 0.0  ;;  %v41_v14 = vsel %vm37_vm0, %v36_v13, 0.0  ;;  %v334_v45 = vld [vmem:[%s507_s3] ss:$0 sm:$0xff]  ;;  %v339_v46 = vld [vmem:[%s507_s3 + $0x1] ss:$0 sm:$0xff] }
   0x8   :  { %39 = vadd.xlane.f32.xlu0 %v38_v11  ;;  %v338_v49 = vld [vmem:[%s507_s3 + $0x6] ss:$0 sm:$0xff]  ;;  %v340_v52 = vld [vmem:[%s507_s3 + $0x7] ss:$0 sm:$0xff]  ;;  %v341_v60 = vld [vmem:[%s507_s3 + $0x2] ss:$0 sm:$0xff] }
   0x9   :  { %232 = vmatpush.bf16.msra.mxu0 %v316_v26  ;;  %v342_v61 = vld [vmem:[%s507_s3 + $0x8] ss:$0 sm:$0xff]  ;;  %v344_v13 = vld [vmem:[%s507_s3 + $0x9] ss:$0 sm:$0xff] }
   0xc   :  { %110 = vperm.xlu1 %324, %v28_v12   ;;  %124 = vperm.xlu2 %325, %v28_v12  }
  0x10   :  { %42 = vadd.xlane.f32.xlu0 %v41_v14 }
  0x14   :  { %327 = vset.pattern.permute.xlu1 %v354_v4  ;;  %328 = vset.pattern.permute.xlu2 %v356_v15 }
  0x15   :  { %138 = vperm.xlu1 %327, %v28_v12   ;;  %148 = vperm.xlu2 %328, %v27_v3  }
  0x1d   :  { %329 = vset.pattern.permute.xlu1 %v356_v15 }
  0x1e   :  { %152 = vperm.xlu1 %329, %v28_v12   ;;  %v343_v12 = vld [vmem:[%s507_s3 + $0x3] ss:$0 sm:$0xff] }
  0x24   :  { %134 = vperm.xlu0 %326, %v27_v3  }
  0x2c   :  { %330 = vset.pattern.permute.xlu0 %v356_v15 }
  0x5e   :  { %v121_v22 = vpop.permute.xlu2 %120 }
  0x5f   :  { %v128_v59 = vmul.f32 %v339_v46, %v121_v22  ;;  %v182_v3 = vmul.f32 %v340_v52, %v121_v22 }
  0x66   :  { %v125_v43 = vpop.permute.xlu2 %124 }
  0x76   :  { %v106_v17 = vpop.permute.xlu1 %105 }
  0x77   :  { %v114_v58 = vmul.f32 %v334_v45, %v106_v17  ;;  %v176_v0 = vmul.f32 %v338_v49, %v106_v17 }
  0x7b   :  { %v40_v16 = vpop.xlane.xlu0 %39 }
  0x7c   :  { %349 = vrsqrt.f32 %v40_v16  ;;  %vm74_vm2 = vweird.f32 %v40_v16  ;;  %vm51_vm3 = vcmp.eq.f32.partialorder %v40_v16, inf  ;;  %v54_v35 = vand.u32 2147483648, %v40_v16 }
  0x7d   :  { %vm53_vm5 = vcmp.eq.f32.partialorder %v40_v16, 0.0 }
  0x7e   :  { %v425_v30 = vpop.permute.xlu1 %110 }
  0x7f   :  { %v115_v23 = vmul.f32 %v334_v45, %v425_v30 }
  0x82   :  { %v350_v18 = vpop.eup %349 }
  0x83   :  { %v45_v19 = vmul.f32 %v350_v18, %v40_v16  ;;  %v415_v20 = vpop.xlane.xlu0 %42  ;;  %vm75_vm1 = vweird.f32 %v350_v18 }
  0x84   :  { %351 = vrsqrt.f32 %v415_v20  ;;  %vm76_vm4 = vmor %vm74_vm2, %vm75_vm1  ;;  %vm63_vm7 = vcmp.eq.f32.partialorder %v415_v20, inf  ;;  %v66_v2 = vand.u32 2147483648, %v415_v20  ;;  %vm84_vm8 = vweird.f32 %v415_v20 }
  0x85   :  { %v46_v21 = vmul.f32 %v350_v18, %v45_v19  ;;  %vm65_vm9 = vcmp.eq.f32.partialorder %v415_v20, 0.0 }
  0x87   :  { %v47_v24 = vmul.f32 0.5, %v46_v21  ;;  %v139_v57 = vpop.permute.xlu1 %138 }
  0x89   :  { %v48_v25 = vsub.f32 1.5, %v47_v24  ;;  %v177_v24 = vmul.f32 %v338_v49, %v425_v30 }
  0x8a   :  { %v352_v27 = vpop.eup %351 }
  0x8b   :  { %v49_v28 = vmul.f32 %v350_v18, %v48_v25  ;;  %v57_v29 = vmul.f32 %v352_v27, %v415_v20  ;;  %vm85_vm6 = vweird.f32 %v352_v27 }
  0x8c   :  { %vm86_vm10 = vmor %vm84_vm8, %vm85_vm6 }
  0x8d   :  { %v50_v31 = vmul.f32 %v49_v28, %v40_v16  ;;  %v58_v34 = vmul.f32 %v352_v27, %v57_v29  ;;  %v77_v39 = vsel %vm76_vm4, %v350_v18, %v49_v28  ;;  %v149_v18 = vpop.permute.xlu2 %148 }
  0x8e   :  { %v98_v51 = vmul.f32 %v333_v36, %v77_v39  ;;  %v170_v55 = vmul.f32 %v337_v37, %v77_v39  ;;  %v156_v25 = vmul.f32 %v343_v12, %v149_v18  ;;  %v194_v26 = vmul.f32 %v344_v13, %v149_v18 }
  0x8f   :  { %v52_v38 = vsel %vm51_vm3, %v40_v16, %v50_v31  ;;  %v59_v42 = vmul.f32 0.5, %v58_v34  ;;  %v143_v39 = vmul.f32 %v341_v60, %v139_v57 }
  0x90   :  { %v55_v44 = vsel %vm53_vm5, %v54_v35, %v52_v38  ;;  %v153_v34 = vpop.permute.xlu1 %152  ;;  %v129_v35 = vmul.f32 %v339_v46, %v125_v43  ;;  %v183_v38 = vmul.f32 %v340_v52, %v125_v43  ;;  %v319_v43 = vld [vmem:[%s510_s5 + $0x8] sm:$0xff]  ;;  %v318_v46 = vld [vmem:[%s510_s5] sm:$0xff] }
  0x91   :  { %v91_v47 = vmul.f32 %v331_v32, %v55_v44  ;;  %v163_v48 = vmul.f32 %v335_v33, %v55_v44  ;;  %v60_v50 = vsub.f32 1.5, %v59_v42  ;;  %283 = vmatpush.bf16.msra.mxu1 %v319_v43  ;;  %v345_v52 = vld [vmem:[%s508_s6 + $0x2] ss:$0 sm:$0xff] }
  0x93   :  { %v94_v53 = vadd.f32 %v332_v40, %v91_v47  ;;  %v166_v54 = vadd.f32 %v336_v41, %v163_v48  ;;  %v61_v56 = vmul.f32 %v352_v27, %v60_v50 }
  0x95   :  { %v100_v62 = vadd.f32 %v98_v51, %v94_v53  ;;  %v172_v63 = vadd.f32 %v170_v55, %v166_v54  ;;  %v62_v1 = vmul.f32 %v61_v56, %v415_v20  ;;  %v87_v9 = vsel %vm86_vm10, %v352_v27, %v61_v56  ;;  %284 = vmatpush.bf16.msra.mxu1 %v318_v46 }
  0x96   :  { %v135_v4 = vpop.permute.xlu0 %134  ;;  %v171_v22 = vmul.f32 %v337_v37, %v87_v9 }
  0x97   :  { %v116_v5 = vadd.f32 %v114_v58, %v100_v62  ;;  %v178_v6 = vadd.f32 %v176_v0, %v172_v63  ;;  %v64_v7 = vsel %vm63_vm7, %v415_v20, %v62_v1  ;;  %v142_v10 = vmul.f32 %v341_v60, %v135_v4  ;;  %v346_v60 = vld [vmem:[%s508_s6 + $0x3] ss:$0 sm:$0xff]  ;;  %v347_v63 = vld [vmem:[%s508_s6 + $0x4] ss:$0 sm:$0xff] }
  0x98   :  { %v67_v8 = vsel %vm65_vm9, %v66_v2, %v64_v7  ;;  %v188_v11 = vmul.f32 %v342_v61, %v135_v4  ;;  %v99_v20 = vmul.f32 %v333_v36, %v87_v9  ;;  %v157_v36 = vmul.f32 %v343_v12, %v153_v34 }
  0x99   :  { %v92_v14 = vmul.f32 %v331_v32, %v67_v8  ;;  %v164_v15 = vmul.f32 %v335_v33, %v67_v8  ;;  %v130_v16 = vadd.f32 %v128_v59, %v116_v5  ;;  %v184_v17 = vadd.f32 %v182_v3, %v178_v6 }
  0x9b   :  { %v95_v19 = vadd.f32 %v332_v40, %v92_v14  ;;  %v167_v21 = vadd.f32 %v336_v41, %v164_v15  ;;  %v144_v29 = vadd.f32 %v142_v10, %v130_v16  ;;  %v190_v31 = vadd.f32 %v188_v11, %v184_v17  ;;  %v348_v11 = vld [vmem:[%s508_s6 + $0x5] ss:$0 sm:$0xff] }
  0x9c   :  { %v189_v40 = vmul.f32 %v342_v61, %v139_v57  ;;  %v195_v41 = vmul.f32 %v344_v13, %v153_v34 }
  0x9d   :  { %v101_v27 = vadd.f32 %v99_v20, %v95_v19  ;;  %v173_v28 = vadd.f32 %v171_v22, %v167_v21  ;;  %v158_v44 = vadd.f32 %v156_v25, %v144_v29  ;;  %v196_v45 = vadd.f32 %v194_v26, %v190_v31 }
  0x9f   :  { %v117_v32 = vadd.f32 %v115_v23, %v101_v27  ;;  %v179_v33 = vadd.f32 %v177_v24, %v173_v28  ;;  %v198_v48 = vadd.f32 %v196_v45, %v158_v44 }
  0xa1   :  { %v131_v37 = vadd.f32 %v129_v35, %v117_v32  ;;  %v185_v42 = vadd.f32 %v183_v38, %v179_v33  ;;  %v200_v53 = vmax.f32 %v198_v48, 0.0 }
  0xa3   :  { %v145_v30 = vadd.f32 %v143_v39, %v131_v37  ;;  %v191_v47 = vadd.f32 %v189_v40, %v185_v42 }
  0xa5   :  { %v159_v49 = vadd.f32 %v157_v36, %v145_v30  ;;  %v197_v50 = vadd.f32 %v195_v41, %v191_v47 }
  0xa7   :  { %v199_v51 = vadd.f32 %v197_v50, %v159_v49 }
  0xa9   :  { %v201_v54 = vmax.f32 %v199_v51, 0.0 }
  0xab   :  { %v202_v55 = vpack.c.bf16 %v201_v54, %v200_v53 }
  0xad   :  { %306 = vmatmul.msk.bf16.vlgmr.msra.gmra.mxu0 %vm221_vm11, %v202_v55 }
 0x12a   :  { %v234_v56 = vpop.f32.mrf.mxu0 }
 0x12b   :  { %v235_v57 = vadd.f32 %v345_v52, %v234_v56 }
 0x12d   :  { %v239_v58 = vadd.f32 %v235_v57, %v158_v44 }
 0x12f   :  { %v241_v59 = vmax.f32 %v239_v58, 0.0 }
 0x131   :  { %v245_v62 = vmul.f32 %v346_v60, %v241_v59 }
 0x132   :  { %v236_v61 = vpop.f32.mrf.mxu0 }
 0x133   :  { %v237_v0 = vadd.f32 %v345_v52, %v236_v61  ;;  %v249_v2 = vadd.f32 %v347_v63, %v245_v62 }
 0x135   :  { %v240_v1 = vadd.f32 %v237_v0, %v159_v49  ;;  %v251_v6 = vadd.f32 %v249_v2, %v158_v44 }
 0x137   :  { %v242_v3 = vmax.f32 %v240_v1, 0.0  ;;  %v253_v8 = vmax.f32 %v251_v6, 0.0 }
 0x139   :  { %v246_v4 = vmul.f32 %v346_v60, %v242_v3 }
 0x13b   :  { %v250_v5 = vadd.f32 %v347_v63, %v246_v4 }
 0x13d   :  { %v252_v7 = vadd.f32 %v250_v5, %v159_v49 }
 0x13f   :  { %v254_v9 = vmax.f32 %v252_v7, 0.0 }
 0x141   :  { %v255_v10 = vpack.c.bf16 %v254_v9, %v253_v8 }
 0x143   :  { %315 = vmatmul.msk.bf16.vlgmr.msra.gmra.mxu1 %vm221_vm11, %v255_v10 }
 0x1c0   :  { %v286_v12 = vpop.f32.mrf.mxu1 }
 0x1c1   :  { %v287_v13 = vadd.f32 %v348_v11, %v286_v12 }
 0x1c3   :  { %292 = vst.msk [vmem:[%s511_s7] sm:$0xff] %vm291_vm12, %v287_v13 }
 0x1c8   :  { %v288_v14 = vpop.f32.mrf.mxu1 }
 0x1c9   :  { %v289_v15 = vadd.f32 %v348_v11, %v288_v14 }
 0x1cb   :  { %293 = vst.msk [vmem:[%s511_s7 + $0x8] sm:$0xff] %vm291_vm12, %v289_v15 }

</bundles_post_ra>
